<compile_context>
chip_gen: v7x
topology: tpu7x:2x2x1
jax: 0.10.0
libtpu: 0.0.40
codegen_flags: <defaults>
</compile_context>

<pallas_src>
import functools

import numpy as np
import jax
import jax.numpy as jnp
from jax.experimental import pallas as pl
from jax.experimental.pallas import tpu as pltpu

BN_EPS = 1e-5
NEG_SLOPE = 0.01


def _lrelu(v):
    return jnp.where(v > 0, v, NEG_SLOPE * v)


# ------------------------------- kernel -------------------------------------

def _impedance_kernel(x_ref, w_enc_ref, b_enc_ref, w_fus_ref,
                      w_stack_ref, b_stack_ref, out_ref):
    # x_ref is a batch-major (TILE, IN) block; everything downstream is feature-major
    # [features, TILE] so the batch lives in lanes (lane-dense vregs + lane-dense store).
    x = x_ref[...]                                              # (TILE, IN)

    # Fused multi-scale encoders (AvgPool + eval-mode BN folded into w_enc).
    # Contract both last dims -> (3H, TILE); no explicit transpose of x is materialized.
    enc = jax.lax.dot_general(
        w_enc_ref[...], x, (((1,), (1,)), ((), ())),
        preferred_element_type=jnp.float32)
    enc = _lrelu(enc + b_enc_ref[...])                          # (3H, TILE)

    # Fusion layer: one (H, 3H) @ (3H, TILE) matmul (replaces three split dots).
    h = _lrelu(jnp.dot(w_fus_ref[...], enc,
                       preferred_element_type=jnp.float32) + b_stack_ref[0])

    # Residual blocks (identity shortcut; Dropout = identity; BN folded).
    for blk in range(3):
        t = _lrelu(jnp.dot(w_stack_ref[2 * blk], h,
                           preferred_element_type=jnp.float32)
                   + b_stack_ref[1 + 2 * blk])
        t = (jnp.dot(w_stack_ref[2 * blk + 1], t,
                     preferred_element_type=jnp.float32)
             + b_stack_ref[2 + 2 * blk])
        h = _lrelu(t + h)

    hs = h.shape[0]                                             # hidden_size

    # Output head (no BN).  Head weights are zero-padded into w_stack slots 6..8.
    wo1 = w_stack_ref[6][:hs // 2, :]                           # (H/2, H)
    o = _lrelu(jnp.dot(wo1, h, preferred_element_type=jnp.float32)
               + b_stack_ref[7][:hs // 2])
    wo2 = w_stack_ref[7][:hs // 4, :hs // 2]                    # (H/4, H/2)
    o = _lrelu(jnp.dot(wo2, o, preferred_element_type=jnp.float32)
               + b_stack_ref[8][:hs // 4])

    # Final (H/4 -> 1) layer on the VPU/XLU (weighted sublane reduction) instead of a
    # degenerate N=1 MXU matmul; output stays lane-dense (1, TILE).
    wo3 = w_stack_ref[8][:hs // 4, 0:1]                         # (H/4, 1)
    out_ref[...] = (jnp.sum(o * wo3, axis=0, keepdims=True)
                    + b_stack_ref[9][0:1]).astype(out_ref.dtype)


# ------------------------------- wrapper -------------------------------------

def _resident_spec(arr):
    """Whole-array VMEM block whose index_map is constant -> stays resident across grid."""
    zeros = (0,) * arr.ndim
    return pl.BlockSpec(arr.shape, lambda i, _z=zeros: _z)


@functools.partial(jax.jit, static_argnames=("tile",))
def multi_scale_impedance_forward(x, params, *, tile=128):
    w_enc, b_enc, w_fus, w_stack, b_stack = params
    batch, in_f = x.shape

    tile_b = min(tile, batch)
    padded = tile_b * pl.cdiv(batch, tile_b)
    x_p = x if padded == batch else jnp.pad(x, ((0, padded - batch), (0, 0)))
    grid = (padded // tile_b,)

    out = pl.pallas_call(
        _impedance_kernel,
        out_shape=jax.ShapeDtypeStruct((1, padded), jnp.float32),
        grid=grid,
        in_specs=[
            pl.BlockSpec((tile_b, in_f), lambda i: (i, 0)),     # x: tiled over batch
            _resident_spec(w_enc),
            _resident_spec(b_enc),
            _resident_spec(w_fus),
            _resident_spec(w_stack),
            _resident_spec(b_stack),
        ],
        out_specs=pl.BlockSpec((1, tile_b), lambda i: (0, i)),  # lane-dense output block
        compiler_params=pltpu.CompilerParams(
            dimension_semantics=("parallel",)),                  # v7x: shard batch over 2 TCs
    )(x_p, w_enc, b_enc, w_fus, w_stack, b_stack)

    # (1, padded) -> (padded, 1) is a pure reshape; then drop padded rows.
    return out.reshape(padded, 1)[:batch]


# --------------------------- parameter building ------------------------------

def _kaiming_linear(key, in_f, out_f):
    """PyTorch kaiming_normal_(mode='fan_out', nonlinearity='leaky_relu'), zero bias."""
    gain = float(np.sqrt(2.0 / (1.0 + NEG_SLOPE ** 2)))
    std = gain / float(np.sqrt(out_f))            # fan_out = out_features
    w = std * jax.random.normal(key, (out_f, in_f), jnp.float32)   # PyTorch [out, in]
    return np.asarray(w, np.float32), np.zeros((out_f,), np.float32)


def _fold_bn(w, b, gamma, beta, mean, var, eps=BN_EPS):
    """Fold an eval-mode BatchNorm1d (general stats) into the preceding Linear."""
    scale = (gamma / np.sqrt(var + eps)).astype(np.float32)
    return w * scale[:, None], (b - mean) * scale + beta


def _fresh_bn(n):
    """Freshly-initialized BN running stats: gamma=1, beta=0, mean=0, var=1."""
    return (np.ones(n, np.float32), np.zeros(n, np.float32),
            np.zeros(n, np.float32), np.ones(n, np.float32))


def _pool_matrix(width, k):
    """AvgPool1d(kernel=k, stride=k) as a (width//k, width) matrix (feature-major)."""
    out_len = width // k
    m = np.zeros((out_len, width), np.float32)
    for j in range(out_len):
        m[j, j * k:(j + 1) * k] = 1.0 / k
    return m


def build_params(key, input_size, hidden_size, output_size=1):
    assert input_size % 4 == 0, "AvgPool1d(2)/(4) folding requires input_size % 4 == 0"
    assert output_size == 1, "VPU-reduce output head assumes output_size == 1"
    H = hidden_size
    keys = jax.random.split(key, 16)
    ki = iter(keys)

    # Multi-scale encoders: fold AvgPool + eval-mode BN into one (3H, input_size) weight.
    enc_w, enc_b = [], []
    for k, in_f in ((1, input_size), (2, input_size // 2), (4, input_size // 4)):
        w, b = _kaiming_linear(next(ki), in_f, H)
        w, b = _fold_bn(w, b, *_fresh_bn(H))
        if k > 1:
            w = w @ _pool_matrix(input_size, k)      # (H, in_f) @ (in_f, in) -> (H, in)
        enc_w.append(w)
        enc_b.append(b)
    w_enc = np.concatenate(enc_w, axis=0)            # (3H, in)
    b_enc = np.concatenate(enc_b, axis=0)[:, None]   # (3H, 1)

    # Fusion Linear(3H -> H) -> BN.
    w_fus, bf = _kaiming_linear(next(ki), 3 * H, H)
    w_fus, bf = _fold_bn(w_fus, bf, *_fresh_bn(H))

    # Packed stacks: 6 residual weights + 3 (zero-padded) head weights; all biases.
    w_stack = np.zeros((9, H, H), np.float32)
    b_stack = np.zeros((10, H, 1), np.float32)
    b_stack[0, :, 0] = bf

    for blk in range(3):
        wa, ba = _kaiming_linear(next(ki), H, H)
        wa, ba = _fold_bn(wa, ba, *_fresh_bn(H))
        wb, bb = _kaiming_linear(next(ki), H, H)
        wb, bb = _fold_bn(wb, bb, *_fresh_bn(H))
        w_stack[2 * blk] = wa
        w_stack[2 * blk + 1] = wb
        b_stack[1 + 2 * blk, :, 0] = ba
        b_stack[2 + 2 * blk, :, 0] = bb

    # Output head (no BN): H -> H/2 -> H/4 -> 1, zero-padded into the stacks.
    w1, b1 = _kaiming_linear(next(ki), H, H // 2)
    w2, b2 = _kaiming_linear(next(ki), H // 2, H // 4)
    w3, b3 = _kaiming_linear(next(ki), H // 4, output_size)
    w_stack[6, :H // 2, :] = w1
    w_stack[7, :H // 4, :H // 2] = w2
    w_stack[8, :H // 4, :output_size] = w3.T
    b_stack[7, :H // 2, 0] = b1
    b_stack[8, :H // 4, 0] = b2
    b_stack[9, :output_size, 0] = b3

    return (jnp.asarray(w_enc), jnp.asarray(b_enc), jnp.asarray(w_fus),
            jnp.asarray(w_stack), jnp.asarray(b_stack))


# --------------------------- pure-JAX reference ------------------------------

def _reference_forward(x, params):
    w_enc, b_enc, w_fus, w_stack, b_stack = params
    hp = jax.lax.Precision.HIGHEST
    lrelu = lambda v: jnp.where(v > 0, v, NEG_SLOPE * v)
    a = lrelu(jnp.dot(w_enc, x.T, precision=hp) + b_enc)
    h = lrelu(jnp.dot(w_fus, a, precision=hp) + b_stack[0])
    for blk in range(3):
        t = lrelu(jnp.dot(w_stack[2 * blk], h, precision=hp) + b_stack[1 + 2 * blk])
        t = jnp.dot(w_stack[2 * blk + 1], t, precision=hp) + b_stack[2 + 2 * blk]
        h = lrelu(t + h)
    H = h.shape[0]
    o = lrelu(jnp.dot(w_stack[6][:H // 2], h, precision=hp) + b_stack[7][:H // 2])
    o = lrelu(jnp.dot(w_stack[7][:H // 4, :H // 2], o, precision=hp) + b_stack[8][:H // 4])
    out = jnp.sum(o * w_stack[8][:H // 4, 0:1], axis=0, keepdims=True) + b_stack[9][0:1]
    return out.T


if __name__ == "__main__":
    batch = 200          # non-multiple of the 128-row tile: exercises padding + 2-step grid
    input_size = 16      # window_size; divisible by 4 so AvgPool needs no padding
    hidden_size = 32
    output_size = 1

    key = jax.random.PRNGKey(0)
    k_x, k_p = jax.random.split(key)
    x = jax.random.normal(k_x, (batch, input_size), jnp.float32)
    params = build_params(k_p, input_size, hidden_size, output_size)

    out = multi_scale_impedance_forward(x, params)
    jax.block_until_ready(out)
    assert out.shape == (batch, output_size), out.shape

    ref = _reference_forward(x, params)
    np.testing.assert_allclose(np.asarray(out), np.asarray(ref), rtol=2e-3, atol=2e-3)
    print("KERNEL_OK")
</pallas_src>

<mosaic_0001>
module attributes {stable_mosaic.version = 11 : i64} {
  func.func @_impedance_kernel(%arg0: i32, %arg1: memref<128x16xf32, #tpu.memory_space<vmem>>, %arg2: memref<96x16xf32, #tpu.memory_space<vmem>>, %arg3: memref<96x1xf32, #tpu.memory_space<vmem>>, %arg4: memref<32x96xf32, #tpu.memory_space<vmem>>, %arg5: memref<9x32x32xf32, #tpu.memory_space<vmem>>, %arg6: memref<10x32x1xf32, #tpu.memory_space<vmem>>, %arg7: memref<1x128xf32, #tpu.memory_space<vmem>>) attributes {dimension_semantics = [#tpu.dimension_semantics<parallel>], iteration_bounds = array<i64: 2>, scalar_prefetch = 0 : i64, scratch_operands = 0 : i64, tpu.core_type = #tpu.core_type<tc>, window_params = [{transform_indices = @transform_0, window_bounds = array<i64: 128, 16>}, {pipeline_mode = #tpu.pipeline_mode<synchronous>, transform_indices = @transform_1, window_bounds = array<i64: 96, 16>}, {pipeline_mode = #tpu.pipeline_mode<synchronous>, transform_indices = @transform_2, window_bounds = array<i64: 96, 1>}, {pipeline_mode = #tpu.pipeline_mode<synchronous>, transform_indices = @transform_3, window_bounds = array<i64: 32, 96>}, {pipeline_mode = #tpu.pipeline_mode<synchronous>, transform_indices = @transform_4, window_bounds = array<i64: 9, 32, 32>}, {pipeline_mode = #tpu.pipeline_mode<synchronous>, transform_indices = @transform_5, window_bounds = array<i64: 10, 32, 1>}, {transform_indices = @transform_6, window_bounds = array<i64: 1, 128>}]} {
    %c0 = arith.constant 0 : index
    %c0_0 = arith.constant 0 : index
    %0 = vector.load %arg1[%c0, %c0_0] : memref<128x16xf32, #tpu.memory_space<vmem>>, vector<128x16xf32>
    %c0_1 = arith.constant 0 : index
    %c0_2 = arith.constant 0 : index
    %1 = vector.load %arg2[%c0_1, %c0_2] : memref<96x16xf32, #tpu.memory_space<vmem>>, vector<96x16xf32>
    %cst = arith.constant dense<0.000000e+00> : vector<96x128xf32>
    %2 = tpu.matmul %1, %0, %cst {dimension_numbers = #tpu.dot_dimension_numbers<[1], [1], [0], [0], [0, 0, 1, 0], [], []>} : vector<96x16xf32>, vector<128x16xf32>, vector<96x128xf32> -> vector<96x128xf32>
    %c0_3 = arith.constant 0 : index
    %c0_4 = arith.constant 0 : index
    %3 = vector.load %arg3[%c0_3, %c0_4] : memref<96x1xf32, #tpu.memory_space<vmem>>, vector<96x1xf32>
    %4 = vector.broadcast %3 : vector<96x1xf32> to vector<96x128xf32>
    %5 = arith.addf %2, %4 : vector<96x128xf32>
    %cst_5 = arith.constant 0.000000e+00 : f32
    %6 = vector.broadcast %cst_5 : f32 to vector<96x128xf32>
    %7 = arith.cmpf ogt, %5, %6 : vector<96x128xf32>
    %cst_6 = arith.constant 0.00999999977 : f32
    %8 = vector.broadcast %cst_6 : f32 to vector<96x128xf32>
    %9 = arith.mulf %8, %5 : vector<96x128xf32>
    %10 = arith.select %7, %5, %9 : vector<96x128xi1>, vector<96x128xf32>
    %c0_7 = arith.constant 0 : index
    %c0_8 = arith.constant 0 : index
    %11 = vector.load %arg4[%c0_7, %c0_8] : memref<32x96xf32, #tpu.memory_space<vmem>>, vector<32x96xf32>
    %cst_9 = arith.constant dense<0.000000e+00> : vector<32x128xf32>
    %12 = tpu.matmul %11, %10, %cst_9 {dimension_numbers = #tpu.dot_dimension_numbers<[1], [0], [0], [1], [0, 0, 1, 1], [], []>} : vector<32x96xf32>, vector<96x128xf32>, vector<32x128xf32> -> vector<32x128xf32>
    %c0_10 = arith.constant 0 : index
    %c0_11 = arith.constant 0 : index
    %c0_12 = arith.constant 0 : index
    %13 = vector.load %arg6[%c0_10, %c0_11, %c0_12] : memref<10x32x1xf32, #tpu.memory_space<vmem>>, vector<1x32x1xf32>
    %14 = vector.shape_cast %13 : vector<1x32x1xf32> to vector<32x1xf32>
    %15 = vector.broadcast %14 : vector<32x1xf32> to vector<32x128xf32>
    %16 = arith.addf %12, %15 : vector<32x128xf32>
    %cst_13 = arith.constant 0.000000e+00 : f32
    %17 = vector.broadcast %cst_13 : f32 to vector<32x128xf32>
    %18 = arith.cmpf ogt, %16, %17 : vector<32x128xf32>
    %cst_14 = arith.constant 0.00999999977 : f32
    %19 = vector.broadcast %cst_14 : f32 to vector<32x128xf32>
    %20 = arith.mulf %19, %16 : vector<32x128xf32>
    %21 = arith.select %18, %16, %20 : vector<32x128xi1>, vector<32x128xf32>
    %c0_15 = arith.constant 0 : index
    %c0_16 = arith.constant 0 : index
    %c0_17 = arith.constant 0 : index
    %22 = vector.load %arg5[%c0_15, %c0_16, %c0_17] : memref<9x32x32xf32, #tpu.memory_space<vmem>>, vector<1x32x32xf32>
    %23 = vector.shape_cast %22 : vector<1x32x32xf32> to vector<32x32xf32>
    %cst_18 = arith.constant dense<0.000000e+00> : vector<32x128xf32>
    %24 = tpu.matmul %23, %21, %cst_18 {dimension_numbers = #tpu.dot_dimension_numbers<[1], [0], [0], [1], [0, 0, 1, 1], [], []>} : vector<32x32xf32>, vector<32x128xf32>, vector<32x128xf32> -> vector<32x128xf32>
    %c1 = arith.constant 1 : index
    %c0_19 = arith.constant 0 : index
    %c0_20 = arith.constant 0 : index
    %25 = vector.load %arg6[%c1, %c0_19, %c0_20] : memref<10x32x1xf32, #tpu.memory_space<vmem>>, vector<1x32x1xf32>
    %26 = vector.shape_cast %25 : vector<1x32x1xf32> to vector<32x1xf32>
    %27 = vector.broadcast %26 : vector<32x1xf32> to vector<32x128xf32>
    %28 = arith.addf %24, %27 : vector<32x128xf32>
    %cst_21 = arith.constant 0.000000e+00 : f32
    %29 = vector.broadcast %cst_21 : f32 to vector<32x128xf32>
    %30 = arith.cmpf ogt, %28, %29 : vector<32x128xf32>
    %cst_22 = arith.constant 0.00999999977 : f32
    %31 = vector.broadcast %cst_22 : f32 to vector<32x128xf32>
    %32 = arith.mulf %31, %28 : vector<32x128xf32>
    %33 = arith.select %30, %28, %32 : vector<32x128xi1>, vector<32x128xf32>
    %c1_23 = arith.constant 1 : index
    %c0_24 = arith.constant 0 : index
    %c0_25 = arith.constant 0 : index
    %34 = vector.load %arg5[%c1_23, %c0_24, %c0_25] : memref<9x32x32xf32, #tpu.memory_space<vmem>>, vector<1x32x32xf32>
    %35 = vector.shape_cast %34 : vector<1x32x32xf32> to vector<32x32xf32>
    %cst_26 = arith.constant dense<0.000000e+00> : vector<32x128xf32>
    %36 = tpu.matmul %35, %33, %cst_26 {dimension_numbers = #tpu.dot_dimension_numbers<[1], [0], [0], [1], [0, 0, 1, 1], [], []>} : vector<32x32xf32>, vector<32x128xf32>, vector<32x128xf32> -> vector<32x128xf32>
    %c2 = arith.constant 2 : index
    %c0_27 = arith.constant 0 : index
    %c0_28 = arith.constant 0 : index
    %37 = vector.load %arg6[%c2, %c0_27, %c0_28] : memref<10x32x1xf32, #tpu.memory_space<vmem>>, vector<1x32x1xf32>
    %38 = vector.shape_cast %37 : vector<1x32x1xf32> to vector<32x1xf32>
    %39 = vector.broadcast %38 : vector<32x1xf32> to vector<32x128xf32>
    %40 = arith.addf %36, %39 : vector<32x128xf32>
    %41 = arith.addf %40, %21 : vector<32x128xf32>
    %cst_29 = arith.constant 0.000000e+00 : f32
    %42 = vector.broadcast %cst_29 : f32 to vector<32x128xf32>
    %43 = arith.cmpf ogt, %41, %42 : vector<32x128xf32>
    %cst_30 = arith.constant 0.00999999977 : f32
    %44 = vector.broadcast %cst_30 : f32 to vector<32x128xf32>
    %45 = arith.mulf %44, %41 : vector<32x128xf32>
    %46 = arith.select %43, %41, %45 : vector<32x128xi1>, vector<32x128xf32>
    %c2_31 = arith.constant 2 : index
    %c0_32 = arith.constant 0 : index
    %c0_33 = arith.constant 0 : index
    %47 = vector.load %arg5[%c2_31, %c0_32, %c0_33] : memref<9x32x32xf32, #tpu.memory_space<vmem>>, vector<1x32x32xf32>
    %48 = vector.shape_cast %47 : vector<1x32x32xf32> to vector<32x32xf32>
    %cst_34 = arith.constant dense<0.000000e+00> : vector<32x128xf32>
    %49 = tpu.matmul %48, %46, %cst_34 {dimension_numbers = #tpu.dot_dimension_numbers<[1], [0], [0], [1], [0, 0, 1, 1], [], []>} : vector<32x32xf32>, vector<32x128xf32>, vector<32x128xf32> -> vector<32x128xf32>
    %c3 = arith.constant 3 : index
    %c0_35 = arith.constant 0 : index
    %c0_36 = arith.constant 0 : index
    %50 = vector.load %arg6[%c3, %c0_35, %c0_36] : memref<10x32x1xf32, #tpu.memory_space<vmem>>, vector<1x32x1xf32>
    %51 = vector.shape_cast %50 : vector<1x32x1xf32> to vector<32x1xf32>
    %52 = vector.broadcast %51 : vector<32x1xf32> to vector<32x128xf32>
    %53 = arith.addf %49, %52 : vector<32x128xf32>
    %cst_37 = arith.constant 0.000000e+00 : f32
    %54 = vector.broadcast %cst_37 : f32 to vector<32x128xf32>
    %55 = arith.cmpf ogt, %53, %54 : vector<32x128xf32>
    %cst_38 = arith.constant 0.00999999977 : f32
    %56 = vector.broadcast %cst_38 : f32 to vector<32x128xf32>
    %57 = arith.mulf %56, %53 : vector<32x128xf32>
    %58 = arith.select %55, %53, %57 : vector<32x128xi1>, vector<32x128xf32>
    %c3_39 = arith.constant 3 : index
    %c0_40 = arith.constant 0 : index
    %c0_41 = arith.constant 0 : index
    %59 = vector.load %arg5[%c3_39, %c0_40, %c0_41] : memref<9x32x32xf32, #tpu.memory_space<vmem>>, vector<1x32x32xf32>
    %60 = vector.shape_cast %59 : vector<1x32x32xf32> to vector<32x32xf32>
    %cst_42 = arith.constant dense<0.000000e+00> : vector<32x128xf32>
    %61 = tpu.matmul %60, %58, %cst_42 {dimension_numbers = #tpu.dot_dimension_numbers<[1], [0], [0], [1], [0, 0, 1, 1], [], []>} : vector<32x32xf32>, vector<32x128xf32>, vector<32x128xf32> -> vector<32x128xf32>
    %c4 = arith.constant 4 : index
    %c0_43 = arith.constant 0 : index
    %c0_44 = arith.constant 0 : index
    %62 = vector.load %arg6[%c4, %c0_43, %c0_44] : memref<10x32x1xf32, #tpu.memory_space<vmem>>, vector<1x32x1xf32>
    %63 = vector.shape_cast %62 : vector<1x32x1xf32> to vector<32x1xf32>
    %64 = vector.broadcast %63 : vector<32x1xf32> to vector<32x128xf32>
    %65 = arith.addf %61, %64 : vector<32x128xf32>
    %66 = arith.addf %65, %46 : vector<32x128xf32>
    %cst_45 = arith.constant 0.000000e+00 : f32
    %67 = vector.broadcast %cst_45 : f32 to vector<32x128xf32>
    %68 = arith.cmpf ogt, %66, %67 : vector<32x128xf32>
    %cst_46 = arith.constant 0.00999999977 : f32
    %69 = vector.broadcast %cst_46 : f32 to vector<32x128xf32>
    %70 = arith.mulf %69, %66 : vector<32x128xf32>
    %71 = arith.select %68, %66, %70 : vector<32x128xi1>, vector<32x128xf32>
    %c4_47 = arith.constant 4 : index
    %c0_48 = arith.constant 0 : index
    %c0_49 = arith.constant 0 : index
    %72 = vector.load %arg5[%c4_47, %c0_48, %c0_49] : memref<9x32x32xf32, #tpu.memory_space<vmem>>, vector<1x32x32xf32>
    %73 = vector.shape_cast %72 : vector<1x32x32xf32> to vector<32x32xf32>
    %cst_50 = arith.constant dense<0.000000e+00> : vector<32x128xf32>
    %74 = tpu.matmul %73, %71, %cst_50 {dimension_numbers = #tpu.dot_dimension_numbers<[1], [0], [0], [1], [0, 0, 1, 1], [], []>} : vector<32x32xf32>, vector<32x128xf32>, vector<32x128xf32> -> vector<32x128xf32>
    %c5 = arith.constant 5 : index
    %c0_51 = arith.constant 0 : index
    %c0_52 = arith.constant 0 : index
    %75 = vector.load %arg6[%c5, %c0_51, %c0_52] : memref<10x32x1xf32, #tpu.memory_space<vmem>>, vector<1x32x1xf32>
    %76 = vector.shape_cast %75 : vector<1x32x1xf32> to vector<32x1xf32>
    %77 = vector.broadcast %76 : vector<32x1xf32> to vector<32x128xf32>
    %78 = arith.addf %74, %77 : vector<32x128xf32>
    %cst_53 = arith.constant 0.000000e+00 : f32
    %79 = vector.broadcast %cst_53 : f32 to vector<32x128xf32>
    %80 = arith.cmpf ogt, %78, %79 : vector<32x128xf32>
    %cst_54 = arith.constant 0.00999999977 : f32
    %81 = vector.broadcast %cst_54 : f32 to vector<32x128xf32>
    %82 = arith.mulf %81, %78 : vector<32x128xf32>
    %83 = arith.select %80, %78, %82 : vector<32x128xi1>, vector<32x128xf32>
    %c5_55 = arith.constant 5 : index
    %c0_56 = arith.constant 0 : index
    %c0_57 = arith.constant 0 : index
    %84 = vector.load %arg5[%c5_55, %c0_56, %c0_57] : memref<9x32x32xf32, #tpu.memory_space<vmem>>, vector<1x32x32xf32>
    %85 = vector.shape_cast %84 : vector<1x32x32xf32> to vector<32x32xf32>
    %cst_58 = arith.constant dense<0.000000e+00> : vector<32x128xf32>
    %86 = tpu.matmul %85, %83, %cst_58 {dimension_numbers = #tpu.dot_dimension_numbers<[1], [0], [0], [1], [0, 0, 1, 1], [], []>} : vector<32x32xf32>, vector<32x128xf32>, vector<32x128xf32> -> vector<32x128xf32>
    %c6 = arith.constant 6 : index
    %c0_59 = arith.constant 0 : index
    %c0_60 = arith.constant 0 : index
    %87 = vector.load %arg6[%c6, %c0_59, %c0_60] : memref<10x32x1xf32, #tpu.memory_space<vmem>>, vector<1x32x1xf32>
    %88 = vector.shape_cast %87 : vector<1x32x1xf32> to vector<32x1xf32>
    %89 = vector.broadcast %88 : vector<32x1xf32> to vector<32x128xf32>
    %90 = arith.addf %86, %89 : vector<32x128xf32>
    %91 = arith.addf %90, %71 : vector<32x128xf32>
    %cst_61 = arith.constant 0.000000e+00 : f32
    %92 = vector.broadcast %cst_61 : f32 to vector<32x128xf32>
    %93 = arith.cmpf ogt, %91, %92 : vector<32x128xf32>
    %cst_62 = arith.constant 0.00999999977 : f32
    %94 = vector.broadcast %cst_62 : f32 to vector<32x128xf32>
    %95 = arith.mulf %94, %91 : vector<32x128xf32>
    %96 = arith.select %93, %91, %95 : vector<32x128xi1>, vector<32x128xf32>
    %c6_63 = arith.constant 6 : index
    %c0_64 = arith.constant 0 : index
    %c0_65 = arith.constant 0 : index
    %97 = vector.load %arg5[%c6_63, %c0_64, %c0_65] : memref<9x32x32xf32, #tpu.memory_space<vmem>>, vector<1x32x32xf32>
    %98 = vector.shape_cast %97 : vector<1x32x32xf32> to vector<32x32xf32>
    %99 = vector.extract_strided_slice %98 {offsets = [0, 0], sizes = [16, 32], strides = [1, 1]} : vector<32x32xf32> to vector<16x32xf32>
    %cst_66 = arith.constant dense<0.000000e+00> : vector<16x128xf32>
    %100 = tpu.matmul %99, %96, %cst_66 {dimension_numbers = #tpu.dot_dimension_numbers<[1], [0], [0], [1], [0, 0, 1, 1], [], []>} : vector<16x32xf32>, vector<32x128xf32>, vector<16x128xf32> -> vector<16x128xf32>
    %c7 = arith.constant 7 : index
    %c0_67 = arith.constant 0 : index
    %c0_68 = arith.constant 0 : index
    %101 = vector.load %arg6[%c7, %c0_67, %c0_68] : memref<10x32x1xf32, #tpu.memory_space<vmem>>, vector<1x32x1xf32>
    %102 = vector.shape_cast %101 : vector<1x32x1xf32> to vector<32x1xf32>
    %103 = vector.extract_strided_slice %102 {offsets = [0, 0], sizes = [16, 1], strides = [1, 1]} : vector<32x1xf32> to vector<16x1xf32>
    %104 = vector.broadcast %103 : vector<16x1xf32> to vector<16x128xf32>
    %105 = arith.addf %100, %104 : vector<16x128xf32>
    %cst_69 = arith.constant 0.000000e+00 : f32
    %106 = vector.broadcast %cst_69 : f32 to vector<16x128xf32>
    %107 = arith.cmpf ogt, %105, %106 : vector<16x128xf32>
    %cst_70 = arith.constant 0.00999999977 : f32
    %108 = vector.broadcast %cst_70 : f32 to vector<16x128xf32>
    %109 = arith.mulf %108, %105 : vector<16x128xf32>
    %110 = arith.select %107, %105, %109 : vector<16x128xi1>, vector<16x128xf32>
    %c7_71 = arith.constant 7 : index
    %c0_72 = arith.constant 0 : index
    %c0_73 = arith.constant 0 : index
    %111 = vector.load %arg5[%c7_71, %c0_72, %c0_73] : memref<9x32x32xf32, #tpu.memory_space<vmem>>, vector<1x32x32xf32>
    %112 = vector.shape_cast %111 : vector<1x32x32xf32> to vector<32x32xf32>
    %113 = vector.extract_strided_slice %112 {offsets = [0, 0], sizes = [8, 16], strides = [1, 1]} : vector<32x32xf32> to vector<8x16xf32>
    %cst_74 = arith.constant dense<0.000000e+00> : vector<8x128xf32>
    %114 = tpu.matmul %113, %110, %cst_74 {dimension_numbers = #tpu.dot_dimension_numbers<[1], [0], [0], [1], [0, 0, 1, 1], [], []>} : vector<8x16xf32>, vector<16x128xf32>, vector<8x128xf32> -> vector<8x128xf32>
    %c8 = arith.constant 8 : index
    %c0_75 = arith.constant 0 : index
    %c0_76 = arith.constant 0 : index
    %115 = vector.load %arg6[%c8, %c0_75, %c0_76] : memref<10x32x1xf32, #tpu.memory_space<vmem>>, vector<1x32x1xf32>
    %116 = vector.shape_cast %115 : vector<1x32x1xf32> to vector<32x1xf32>
    %117 = vector.extract_strided_slice %116 {offsets = [0, 0], sizes = [8, 1], strides = [1, 1]} : vector<32x1xf32> to vector<8x1xf32>
    %118 = vector.broadcast %117 : vector<8x1xf32> to vector<8x128xf32>
    %119 = arith.addf %114, %118 : vector<8x128xf32>
    %cst_77 = arith.constant 0.000000e+00 : f32
    %120 = vector.broadcast %cst_77 : f32 to vector<8x128xf32>
    %121 = arith.cmpf ogt, %119, %120 : vector<8x128xf32>
    %cst_78 = arith.constant 0.00999999977 : f32
    %122 = vector.broadcast %cst_78 : f32 to vector<8x128xf32>
    %123 = arith.mulf %122, %119 : vector<8x128xf32>
    %124 = arith.select %121, %119, %123 : vector<8x128xi1>, vector<8x128xf32>
    %c8_79 = arith.constant 8 : index
    %c0_80 = arith.constant 0 : index
    %c0_81 = arith.constant 0 : index
    %125 = vector.load %arg5[%c8_79, %c0_80, %c0_81] : memref<9x32x32xf32, #tpu.memory_space<vmem>>, vector<1x32x32xf32>
    %126 = vector.shape_cast %125 : vector<1x32x32xf32> to vector<32x32xf32>
    %127 = vector.extract_strided_slice %126 {offsets = [0, 0], sizes = [8, 1], strides = [1, 1]} : vector<32x32xf32> to vector<8x1xf32>
    %128 = vector.broadcast %127 : vector<8x1xf32> to vector<8x128xf32>
    %129 = arith.mulf %124, %128 : vector<8x128xf32>
    %cst_82 = arith.constant dense<0.000000e+00> : vector<128xf32>
    %130 = vector.multi_reduction <add>, %129, %cst_82 [0] : vector<8x128xf32> to vector<128xf32>
    %131 = vector.shape_cast %130 : vector<128xf32> to vector<1x128xf32>
    %c9 = arith.constant 9 : index
    %c0_83 = arith.constant 0 : index
    %c0_84 = arith.constant 0 : index
    %132 = vector.load %arg6[%c9, %c0_83, %c0_84] : memref<10x32x1xf32, #tpu.memory_space<vmem>>, vector<1x32x1xf32>
    %133 = vector.shape_cast %132 : vector<1x32x1xf32> to vector<32x1xf32>
    %134 = vector.extract_strided_slice %133 {offsets = [0, 0], sizes = [1, 1], strides = [1, 1]} : vector<32x1xf32> to vector<1x1xf32>
    %135 = vector.broadcast %134 : vector<1x1xf32> to vector<1x128xf32>
    %136 = arith.addf %131, %135 : vector<1x128xf32>
    %c0_85 = arith.constant 0 : index
    %c0_86 = arith.constant 0 : index
    %137 = vector.load %arg7[%c0_85, %c0_86] : memref<1x128xf32, #tpu.memory_space<vmem>>, vector<1x128xf32>
    tpu.vector_store %arg7[%c0_85, %c0_86], %136 {strides = array<i32>} : memref<1x128xf32, #tpu.memory_space<vmem>>, vector<1x128xf32>,
    return
  }
  func.func @transform_0(%arg0: i32) -> (i32, i32) {
    %c0_i32 = arith.constant 0 : i32
    %c0_i32_0 = arith.constant 0 : i32
    return %arg0, %c0_i32 : i32, i32
  }
  func.func @transform_1(%arg0: i32) -> (i32, i32) {
    %c0_i32 = arith.constant 0 : i32
    %c0_i32_0 = arith.constant 0 : i32
    %c0_i32_1 = arith.constant 0 : i32
    return %c0_i32, %c0_i32_0 : i32, i32
  }
  func.func @transform_2(%arg0: i32) -> (i32, i32) {
    %c0_i32 = arith.constant 0 : i32
    %c0_i32_0 = arith.constant 0 : i32
    %c0_i32_1 = arith.constant 0 : i32
    return %c0_i32, %c0_i32_0 : i32, i32
  }
  func.func @transform_3(%arg0: i32) -> (i32, i32) {
    %c0_i32 = arith.constant 0 : i32
    %c0_i32_0 = arith.constant 0 : i32
    %c0_i32_1 = arith.constant 0 : i32
    return %c0_i32, %c0_i32_0 : i32, i32
  }
  func.func @transform_4(%arg0: i32) -> (i32, i32, i32) {
    %c0_i32 = arith.constant 0 : i32
    %c0_i32_0 = arith.constant 0 : i32
    %c0_i32_1 = arith.constant 0 : i32
    %c0_i32_2 = arith.constant 0 : i32
    return %c0_i32, %c0_i32_0, %c0_i32_1 : i32, i32, i32
  }
  func.func @transform_5(%arg0: i32) -> (i32, i32, i32) {
    %c0_i32 = arith.constant 0 : i32
    %c0_i32_0 = arith.constant 0 : i32
    %c0_i32_1 = arith.constant 0 : i32
    %c0_i32_2 = arith.constant 0 : i32
    return %c0_i32, %c0_i32_0, %c0_i32_1 : i32, i32, i32
  }
  func.func @transform_6(%arg0: i32) -> (i32, i32) {
    %c0_i32 = arith.constant 0 : i32
    %c0_i32_0 = arith.constant 0 : i32
    return %c0_i32, %arg0 : i32, i32
  }
}

</mosaic_0001>

<bundles_post_ra>
// kernel: multi_scale_impedance_forward.1
= control target key start
LH: loop header
LB: loop body
LE: loop exit
PB: predicated region body
PF: predicated region fallthrough
CT: control target
= control target key end

     0   :  { %s2433_s21 = smov 0   ;;  %s2866_s0 = inlined_call_operand.vmem [shape: f32[256,16], index: 0, kind: input, shape index: {}]   ;;  %s2867_s1 = inlined_call_operand.vmem [shape: f32[96,16], index: 1, kind: input, shape index: {}]   ;;  %s2868_s2 = inlined_call_operand.vmem [shape: f32[96,1], index: 2, kind: input, shape index: {}]   ;;  %s2869_s3 = inlined_call_operand.vmem [shape: f32[32,96], index: 3, kind: input, shape index: {}]   ;;  %s2870_s4 = inlined_call_operand.vmem [shape: f32[9,32,32], index: 4, kind: input, shape index: {}]   ;;  %s2871_s5 = inlined_call_operand.vmem [shape: f32[10,32,1], index: 5, kind: input, shape index: {}]   ;;  %s2872_s6 = inlined_call_operand.vmem [shape: f32[1,256], index: 6, kind: output, shape index: {}]  }
   0x1 LB: > { %s2439_s22 = sadd.s32 4294967295, %s2392_s21   ;;  %p1842_p0 = scmp.ge.s32.totalorder %s2392_s21, 1  ;;  %s2392_s21 = sphi %s2433_s21, %s16_s21  }
   0x2   : > { %p213_p1 = scmp.lt.s32.totalorder %s2392_s21, 3 }
   0x4   : > { %p214_p2 = pnand %p1842_p0, %p213_p1 }
   0x5   : > { %s1843_s23 = sshll.u32 (!%p214_p2), %s2439_s22, 4  ;;  %vm350_vm0 = vcmask (!%p214_p2), 130048   ;;  %v278_v0 = vld [vmem:[%s2868_s2] sm:$0xff] (!%p214_p2)  ;;  %v2394_v2 = vmov (!%p214_p2), 0   ;;  %v280_v3 = vld [vmem:[%s2868_s2 + $0x10] sm:$0xff] (!%p214_p2)  ;;  %v279_v4 = vld [vmem:[%s2868_s2 + $0x8] sm:$0xff] (!%p214_p2) }
   0x6   : > { %217 = sbr.rel (%p214_p2) target bundleno = 2386 (0x952), region = 44  ;;  %v266_v1 = vld [vmem:[%s2867_s1] sm:$0xff] (!%p214_p2)  ;;  %p242_p3 = scmp.lt.s32.totalorder (!%p214_p2), %s1843_s23, 31  ;;  %2384 = vset.pattern.permute.xlu0 (!%p214_p2), %v2394_v2  ;;  %2385 = vset.pattern.permute.xlu1 (!%p214_p2), %v2394_v2  ;;  %v281_v5 = vld [vmem:[%s2868_s2 + $0x18] sm:$0xff] (!%p214_p2)  ;;  %vm2467_vm1 = vmpackc.low (!%p214_p2), %vm350_vm0, %vm350_vm0  ;;  %vm624_vm2 = vcmask (!%p214_p2), 785408   ;;  %vm763_vm15 = vcmask (!%p214_p2), 261120  }
   0x7   : > { %2091 = vmatprep.mubr.msk.f32.mxu0 (!%p214_p2), %vm350_vm0, %v266_v1  ;;  %292 = vperm.xlu0 (!%p214_p2), %2384, %v278_v0   ;;  %v282_v7 = vld [vmem:[%s2868_s2 + $0x20] sm:$0xff] (!%p214_p2)  ;;  %v283_v13 = vld [vmem:[%s2868_s2 + $0x28] sm:$0xff] (!%p214_p2)  ;;  %v284_v15 = vld [vmem:[%s2868_s2 + $0x30] sm:$0xff] (!%p214_p2)  ;;  %p247_p4 = scmp.lt.s32.totalorder (!%p214_p2), %s2439_s22, 1 }
   0x8   : > { %302 = vperm.xlu1 (!%p214_p2), %2385, %v280_v3   ;;  %v285_v16 = vld [vmem:[%s2868_s2 + $0x38] sm:$0xff] (!%p214_p2)  ;;  %v286_v19 = vld [vmem:[%s2868_s2 + $0x40] sm:$0xff] (!%p214_p2)  ;;  %v287_v21 = vld [vmem:[%s2868_s2 + $0x48] sm:$0xff] (!%p214_p2) }
   0x9   : > { %v288_v22 = vld [vmem:[%s2868_s2 + $0x50] sm:$0xff] (!%p214_p2)  ;;  %v289_v23 = vld [vmem:[%s2868_s2 + $0x58] sm:$0xff] (!%p214_p2)  ;;  %v600_v26 = vld [vmem:[%s2871_s5] sm:$0xff] (!%p214_p2) }
   0xa   : > { %v601_v28 = vld [vmem:[%s2871_s5 + $0x8] sm:$0xff] (!%p214_p2)  ;;  %v602_v29 = vld [vmem:[%s2871_s5 + $0x10] sm:$0xff] (!%p214_p2)  ;;  %v603_v30 = vld [vmem:[%s2871_s5 + $0x18] sm:$0xff] (!%p214_p2) }
   0xb   : > { %297 = vperm.xlu0 (!%p214_p2), %2384, %v279_v4   ;;  %v1877_v33 = vld [vmem:[%s2871_s5 + $0x20] sm:$0xff] (!%p214_p2)  ;;  %v1878_v35 = vld [vmem:[%s2871_s5 + $0x28] sm:$0xff] (!%p214_p2)  ;;  %v1879_v36 = vld [vmem:[%s2871_s5 + $0x30] sm:$0xff] (!%p214_p2) }
   0xc   : > { %307 = vperm.xlu1 (!%p214_p2), %2385, %v281_v5   ;;  %v1880_v37 = vld [vmem:[%s2871_s5 + $0x38] sm:$0xff] (!%p214_p2)  ;;  %v1889_v40 = vld [vmem:[%s2871_s5 + $0x40] sm:$0xff] (!%p214_p2)  ;;  %v1890_v42 = vld [vmem:[%s2871_s5 + $0x48] sm:$0xff] (!%p214_p2) }
   0xd   : > { %s2876_s23 = smov (!%p242_p3, %s1843_s23), 31  ;;  %v1891_v43 = vld [vmem:[%s2871_s5 + $0x50] sm:$0xff]  ;;  %v1892_v44 = vld [vmem:[%s2871_s5 + $0x58] sm:$0xff]  ;;  %v1901_v47 = vld [vmem:[%s2871_s5 + $0x60] sm:$0xff]  ;;  %s2878_s22 = smov (!%p247_p4, %s2439_s22), 1 }
   0xe   : > { %s1844_s10 = sshll.u32 %s2876_s23, 3  ;;  %v1902_v49 = vld [vmem:[%s2871_s5 + $0x68] sm:$0xff]  ;;  %v1903_v50 = vld [vmem:[%s2871_s5 + $0x70] sm:$0xff]  ;;  %v1904_v51 = vld [vmem:[%s2871_s5 + $0x78] sm:$0xff]  ;;  %s249_s7 = scalar_lea.vmem %s2872_s6, %s2878_s22 }
   0xf   : > { %s2463_s13 = scalar_lea.vmem %s2866_s0, %s1844_s10  ;;  %312 = vperm.xlu0 %2384, %v282_v7   ;;  %v1913_v54 = vld [vmem:[%s2871_s5 + $0x80] sm:$0xff]  ;;  %v1914_v56 = vld [vmem:[%s2871_s5 + $0x88] sm:$0xff]  ;;  %v1915_v57 = vld [vmem:[%s2871_s5 + $0x90] sm:$0xff] }
  0x10   : > { %v250_v8 = vld [vmem:[%s2463_s13] sm:$0xff]  ;;  %v251_v9 = vld [vmem:[%s2463_s13 + $0x8] sm:$0xff]  ;;  %v252_v10 = vld [vmem:[%s2463_s13 + $0x10] sm:$0xff]  ;;  %317 = vperm.xlu1 %2385, %v283_v13  }
  0x11   : > { %v2241_v11 = vpack.c.bf16 %v251_v9, %v250_v8  ;;  %v253_v12 = vld [vmem:[%s2463_s13 + $0x18] sm:$0xff]  ;;  %v254_v17 = vld [vmem:[%s2463_s13 + $0x20] sm:$0xff]  ;;  %v255_v18 = vld [vmem:[%s2463_s13 + $0x28] sm:$0xff] }
  0x12   : > { %v2247_v14 = vpack.c.bf16 %v253_v12, %v252_v10  ;;  %v2253_v20 = vpack.c.bf16 %v255_v18, %v254_v17  ;;  %v256_v24 = vld [vmem:[%s2463_s13 + $0x30] sm:$0xff]  ;;  %v257_v25 = vld [vmem:[%s2463_s13 + $0x38] sm:$0xff]  ;;  %v258_v31 = vld [vmem:[%s2463_s13 + $0x40] sm:$0xff] }
  0x13   : > { %2243 = vmatprep.subr.msk.bf16.mxu0 %vm2467_vm1, %v2241_v11  ;;  %322 = vperm.xlu0 %2384, %v284_v15   ;;  %v2259_v27 = vpack.c.bf16 %v257_v25, %v256_v24  ;;  %v259_v32 = vld [vmem:[%s2463_s13 + $0x48] sm:$0xff]  ;;  %v260_v38 = vld [vmem:[%s2463_s13 + $0x50] sm:$0xff]  ;;  %v261_v39 = vld [vmem:[%s2463_s13 + $0x58] sm:$0xff] }
  0x14   : > { %2246 = vmatpush3.bf16.xpose.msk.msra.mxu0 %vm2467_vm1, %v2241_v11  ;;  %327 = vperm.xlu1 %2385, %v285_v16   ;;  %v2265_v34 = vpack.c.bf16 %v259_v32, %v258_v31  ;;  %v2271_v41 = vpack.c.bf16 %v261_v39, %v260_v38  ;;  %v262_v45 = vld [vmem:[%s2463_s13 + $0x60] sm:$0xff]  ;;  %v263_v46 = vld [vmem:[%s2463_s13 + $0x68] sm:$0xff]  ;;  %v264_v52 = vld [vmem:[%s2463_s13 + $0x70] sm:$0xff] }
  0x15   : > { %2249 = vmatprep.subr.msk.bf16.mxu0 %vm2467_vm1, %v2247_v14  ;;  %v2277_v48 = vpack.c.bf16 %v263_v46, %v262_v45  ;;  %v265_v53 = vld [vmem:[%s2463_s13 + $0x78] sm:$0xff]  ;;  %v1925_v59 = vld [vmem:[%s2871_s5 + $0xa0] sm:$0xff]  ;;  %v1926_v60 = vld [vmem:[%s2871_s5 + $0xa8] sm:$0xff] }
  0x16   : > { %v2283_v55 = vpack.c.bf16 %v265_v53, %v264_v52  ;;  %v1916_v58 = vld [vmem:[%s2871_s5 + $0x98] sm:$0xff]  ;;  %v1927_v61 = vld [vmem:[%s2871_s5 + $0xb0] sm:$0xff]  ;;  %v267_v63 = vld [vmem:[%s2867_s1 + $0x8] sm:$0xff] }
  0x17   : > { %332 = vperm.xlu0 %2384, %v286_v19   ;;  %v1928_v62 = vld [vmem:[%s2871_s5 + $0xb8] sm:$0xff]  ;;  %v1937_v0 = vld [vmem:[%s2871_s5 + $0xc0] sm:$0xff]  ;;  %v268_v1 = vld [vmem:[%s2867_s1 + $0x10] sm:$0xff] }
  0x18   : > { %337 = vperm.xlu1 %2385, %v287_v21   ;;  %v1938_v2 = vld [vmem:[%s2871_s5 + $0xc8] sm:$0xff]  ;;  %v269_v3 = vld [vmem:[%s2867_s1 + $0x18] sm:$0xff]  ;;  %v1939_v4 = vld [vmem:[%s2871_s5 + $0xd0] sm:$0xff] }
  0x19   : > { %v270_v5 = vld [vmem:[%s2867_s1 + $0x20] sm:$0xff]  ;;  %v1940_v6 = vld [vmem:[%s2871_s5 + $0xd8] sm:$0xff]  ;;  %v271_v7 = vld [vmem:[%s2867_s1 + $0x28] sm:$0xff] }
  0x1a   : > { %v1947_v8 = vld [vmem:[%s2871_s5 + $0xe0] sm:$0xff]  ;;  %v272_v9 = vld [vmem:[%s2867_s1 + $0x30] sm:$0xff]  ;;  %v1948_v10 = vld [vmem:[%s2871_s5 + $0xe8] sm:$0xff] }
  0x1b   : > { %342 = vperm.xlu0 %2384, %v288_v22   ;;  %v273_v11 = vld [vmem:[%s2867_s1 + $0x38] sm:$0xff]  ;;  %v1952_v12 = vld [vmem:[%s2871_s5 + $0x100] sm:$0xff]  ;;  %v275_v15 = vld [vmem:[%s2867_s1 + $0x48] sm:$0xff] }
  0x1c   : > { %2252 = vmatpush3.bf16.xpose.msk.msra.mxu0 %vm2467_vm1, %v2247_v14  ;;  %347 = vperm.xlu1 %2385, %v289_v23   ;;  %v274_v13 = vld [vmem:[%s2867_s1 + $0x40] sm:$0xff]  ;;  %v276_v17 = vld [vmem:[%s2867_s1 + $0x50] sm:$0xff]  ;;  %v277_v18 = vld [vmem:[%s2867_s1 + $0x58] sm:$0xff] }
  0x1d   : > { %2255 = vmatprep.subr.msk.bf16.mxu0 %vm2467_vm1, %v2253_v20  ;;  %v1954_v14 = vld [vmem:[%s2870_s4 + $0x100] sm:$0xff] }
  0x1e   : > { %v1955_v16 = vld [vmem:[%s2871_s5 + $0x120] sm:$0xff] }
  0x1f   : > { %606 = vperm.xlu0 %2384, %v600_v26   ;;  %v596_v19 = vld [vmem:[%s2869_s3] sm:$0xff] }
  0x20   : > { %611 = vperm.xlu1 %2385, %v601_v28   ;;  %2133 = vmatprep.mubr.msk.f32.mxu1 %vm624_vm2, %v596_v19 }
  0x23   : > { %616 = vperm.xlu0 %2384, %v602_v29  }
  0x24   : > { %2258 = vmatpush3.bf16.xpose.msk.msra.mxu0 %vm2467_vm1, %v2253_v20  ;;  %621 = vperm.xlu1 %2385, %v603_v30  }
  0x25   : > { %2261 = vmatprep.subr.msk.bf16.mxu0 %vm2467_vm1, %v2259_v27 }
  0x27   : > { %745 = vperm.xlu0 %2384, %v1877_v33  }
  0x28   : > { %750 = vperm.xlu1 %2385, %v1878_v35  }
  0x2b   : > { %755 = vperm.xlu0 %2384, %v1879_v36  }
  0x2c   : > { %2264 = vmatpush3.bf16.xpose.msk.msra.mxu0 %vm2467_vm1, %v2259_v27  ;;  %760 = vperm.xlu1 %2385, %v1880_v37  }
  0x2d   : > { %2267 = vmatprep.subr.msk.bf16.mxu0 %vm2467_vm1, %v2265_v34 }
  0x2f   : > { %885 = vperm.xlu0 %2384, %v1889_v40  }
  0x30   : > { %890 = vperm.xlu1 %2385, %v1890_v42  }
  0x33   : > { %895 = vperm.xlu0 %2384, %v1891_v43  }
  0x34   : > { %2270 = vmatpush3.bf16.xpose.msk.msra.mxu0 %vm2467_vm1, %v2265_v34  ;;  %900 = vperm.xlu1 %2385, %v1892_v44  }
  0x35   : > { %2273 = vmatprep.subr.msk.bf16.mxu0 %vm2467_vm1, %v2271_v41 }
  0x37   : > { %1028 = vperm.xlu0 %2384, %v1901_v47  }
  0x38   : > { %1033 = vperm.xlu1 %2385, %v1902_v49  }
  0x3b   : > { %1038 = vperm.xlu0 %2384, %v1903_v50  }
  0x3c   : > { %2276 = vmatpush3.bf16.xpose.msk.msra.mxu0 %vm2467_vm1, %v2271_v41  ;;  %1043 = vperm.xlu1 %2385, %v1904_v51  }
  0x3d   : > { %2279 = vmatprep.subr.msk.bf16.mxu0 %vm2467_vm1, %v2277_v48 }
  0x3f   : > { %1167 = vperm.xlu0 %2384, %v1913_v54  }
  0x40   : > { %1172 = vperm.xlu1 %2385, %v1914_v56  }
  0x43   : > { %1177 = vperm.xlu0 %2384, %v1915_v57  }
  0x44   : > { %2282 = vmatpush3.bf16.xpose.msk.msra.mxu0 %vm2467_vm1, %v2277_v48  ;;  %1182 = vperm.xlu1 %2385, %v1916_v58  }
  0x45   : > { %2285 = vmatprep.subr.msk.bf16.mxu0 %vm2467_vm1, %v2283_v55 }
  0x47   : > { %1310 = vperm.xlu0 %2384, %v1925_v59  }
  0x48   : > { %1315 = vperm.xlu1 %2385, %v1926_v60  }
  0x4b   : > { %1320 = vperm.xlu0 %2384, %v1927_v61  }
  0x4c   : > { %2288 = vmatpush3.bf16.xpose.msk.msra.mxu0 %vm2467_vm1, %v2283_v55  ;;  %1325 = vperm.xlu1 %2385, %v1928_v62  }
  0x4f   : > { %1449 = vperm.xlu0 %2384, %v1937_v0  }
  0x50   : > { %1454 = vperm.xlu1 %2385, %v1938_v2  }
  0x53   : > { %2092 = vmatmul.mubr.msk.f32.vlgmr.msra.gmra.mrb[0].mxu0 %vm350_vm0, %v267_v63  ;;  %1459 = vperm.xlu0 %2384, %v1939_v4  }
  0x54   : > { %2094 = vmatprep.mubr.msk.f32.mxu0 %vm350_vm0, %v268_v1  ;;  %1464 = vperm.xlu1 %2385, %v1940_v6  }
  0x57   : > { %2095 = vmatmul.mubr.msk.f32.gmra.mrb[2].mxu0 %vm350_vm0, %v269_v3  ;;  %1588 = vperm.xlu0 %2384, %v1947_v8  }
  0x58   : > { %2097 = vmatprep.mubr.msk.f32.mxu0 %vm350_vm0, %v270_v5  ;;  %1593 = vperm.xlu1 %2385, %v1948_v10  }
  0x5b   : > { %2098 = vmatmul.mubr.msk.f32.gmra.mrb[4].mxu0 %vm350_vm0, %v271_v7  ;;  %1689 = vperm.xlu0 %2384, %v1952_v12  }
  0x5c   : > { %2100 = vmatprep.mubr.msk.f32.mxu0 %vm350_vm0, %v272_v9  ;;  %1772 = vperm.xlu1 %2385, %v1954_v14  }
  0x5f   : > { %2101 = vmatmul.mubr.msk.f32.gmra.mrb[6].mxu0 %vm350_vm0, %v273_v11  ;;  %1786 = vperm.xlu0 %2384, %v1955_v16  }
  0x60   : > { %2103 = vmatprep.mubr.msk.f32.mxu0 %vm350_vm0, %v274_v13 }
  0x63   : > { %2104 = vmatmul.mubr.msk.f32.gmra.mrb[8].mxu0 %vm350_vm0, %v275_v15 }
  0x64   : > { %2106 = vmatprep.mubr.msk.f32.mxu0 %vm350_vm0, %v276_v17 }
  0x67   : > { %2107 = vmatmul.mubr.msk.f32.gmra.mrb[10].mxu0 %vm350_vm0, %v277_v18 }
  0x86   : > { %v293_v21 = vpop.permute.xlu0 %292 }
  0x87   : > { %v303_v20 = vpop.permute.xlu1 %302 }
  0x8a   : > { %v298_v23 = vpop.permute.xlu0 %297 }
  0x8b   : > { %v308_v22 = vpop.permute.xlu1 %307 }
  0x8e   : > { %v313_v29 = vpop.permute.xlu0 %312 }
  0x8f   : > { %v318_v27 = vpop.permute.xlu1 %317 }
  0x92   : > { %v323_v43 = vpop.permute.xlu0 %322 }
  0x93   : > { %v328_v40 = vpop.permute.xlu1 %327 }
  0x96   : > { %v333_v59 = vpop.permute.xlu0 %332 }
  0x97   : > { %v338_v56 = vpop.permute.xlu1 %337 }
  0x9a   : > { %v343_v10 = vpop.permute.xlu0 %342 }
  0x9b   : > { %v348_v7 = vpop.permute.xlu1 %347 }
 0x126   : > { %v2093_v24 = vpop.f32.mrb[0].mxu0 }
 0x127   : > { %v507_v25 = vadd.f32 %v2093_v24, %v298_v23  ;;  %v501_v26 = vpop.f32.mrb[1].mxu0  ;;  %v598_v23 = vld [vmem:[%s2869_s3 + $0x10] sm:$0xff]  ;;  %v599_v24 = vld [vmem:[%s2869_s3 + $0x18] sm:$0xff] }
 0x128   : > { %v502_v28 = vadd.f32 %v501_v26, %v293_v21  ;;  %v612_v26 = vpop.permute.xlu1 %611 }
 0x129   : > { %v573_v30 = vmul.f32 0.01, %v507_v25  ;;  %vm561_vm3 = vcmp.gt.f32.partialorder %v507_v25, 0.0 }
 0x12a   : > { %v572_v31 = vmul.f32 0.01, %v502_v28  ;;  %v2096_v32 = vpop.f32.mrb[2].mxu0  ;;  %vm560_vm4 = vcmp.gt.f32.partialorder %v502_v28, 0.0 }
 0x12b   : > { %v517_v33 = vadd.f32 %v2096_v32, %v308_v22  ;;  %v511_v34 = vpop.f32.mrb[3].mxu0  ;;  %v585_v35 = vsel %vm561_vm3, %v507_v25, %v573_v30  ;;  %v597_v22 = vld [vmem:[%s2869_s3 + $0x8] sm:$0xff]  ;;  %v734_v25 = vld [vmem:[%s2870_s4] sm:$0xff] }
 0x12c   : > { %v512_v36 = vadd.f32 %v511_v34, %v303_v20  ;;  %v584_v37 = vsel %vm560_vm4, %v502_v28, %v572_v31 }
 0x12d   : > { %vm563_vm5 = vcmp.gt.f32.partialorder %v517_v33, 0.0  ;;  %v575_v38 = vmul.f32 0.01, %v517_v33  ;;  %v2289_v39 = vpack.c.bf16 %v585_v35, %v584_v37 }
 0x12e   : > { %vm562_vm6 = vcmp.gt.f32.partialorder %v512_v36, 0.0  ;;  %v574_v41 = vmul.f32 0.01, %v512_v36  ;;  %v2099_v42 = vpop.f32.mrb[4].mxu0 }
 0x12f   : > { %v527_v44 = vadd.f32 %v2099_v42, %v318_v27  ;;  %v521_v45 = vpop.f32.mrb[5].mxu0  ;;  %2290 = vmatprep.subr.bf16.mxu1 %v2289_v39  ;;  %v587_v46 = vsel %vm563_vm5, %v517_v33, %v575_v38  ;;  %v607_v27 = vpop.permute.xlu0 %606 }
 0x130   : > { %v522_v47 = vadd.f32 %v521_v45, %v313_v29  ;;  %2292 = vmatpush3.bf16.msra.mxu1 %v2289_v39  ;;  %v586_v48 = vsel %vm562_vm6, %v512_v36, %v574_v41  ;;  %v622_v33 = vpop.permute.xlu1 %621 }
 0x131   : > { %vm565_vm7 = vcmp.gt.f32.partialorder %v527_v44, 0.0  ;;  %v577_v49 = vmul.f32 0.01, %v527_v44  ;;  %v2293_v50 = vpack.c.bf16 %v587_v46, %v586_v48  ;;  %v735_v48 = vld [vmem:[%s2870_s4 + $0x8] sm:$0xff] }
 0x132   : > { %vm564_vm8 = vcmp.gt.f32.partialorder %v522_v47, 0.0  ;;  %v576_v51 = vmul.f32 0.01, %v522_v47  ;;  %v2102_v52 = vpop.f32.mrb[6].mxu0 }
 0x133   : > { %v537_v53 = vadd.f32 %v2102_v52, %v328_v40  ;;  %v531_v54 = vpop.f32.mrb[7].mxu0  ;;  %2294 = vmatprep.subr.bf16.mxu1 %v2293_v50  ;;  %v589_v55 = vsel %vm565_vm7, %v527_v44, %v577_v49  ;;  %v617_v36 = vpop.permute.xlu0 %616  ;;  %v736_v49 = vld [vmem:[%s2870_s4 + $0x10] sm:$0xff] }
 0x134   : > { %v532_v57 = vadd.f32 %v531_v54, %v323_v43  ;;  %2296 = vmatpush3.bf16.msra.mxu1 %v2293_v50  ;;  %v588_v58 = vsel %vm564_vm8, %v522_v47, %v576_v51  ;;  %v737_v50 = vld [vmem:[%s2870_s4 + $0x18] sm:$0xff]  ;;  %v1885_v51 = vld [vmem:[%s2870_s4 + $0x20] sm:$0xff]  ;;  %v751_v52 = vpop.permute.xlu1 %750 }
 0x135   : > { %vm567_vm9 = vcmp.gt.f32.partialorder %v537_v53, 0.0  ;;  %v579_v60 = vmul.f32 0.01, %v537_v53  ;;  %v2297_v61 = vpack.c.bf16 %v589_v55, %v588_v58 }
 0x136   : > { %vm566_vm10 = vcmp.gt.f32.partialorder %v532_v57, 0.0  ;;  %v578_v62 = vmul.f32 0.01, %v532_v57  ;;  %v2105_v63 = vpop.f32.mrb[8].mxu0 }
 0x137   : > { %v547_v0 = vadd.f32 %v2105_v63, %v338_v56  ;;  %v541_v1 = vpop.f32.mrb[9].mxu0  ;;  %2298 = vmatprep.subr.bf16.mxu1 %v2297_v61  ;;  %v591_v2 = vsel %vm567_vm9, %v537_v53, %v579_v60  ;;  %v746_v53 = vpop.permute.xlu0 %745 }
 0x138   : > { %v542_v3 = vadd.f32 %v541_v1, %v333_v59  ;;  %2300 = vmatpush3.bf16.msra.mxu1 %v2297_v61  ;;  %v590_v4 = vsel %vm566_vm10, %v532_v57, %v578_v62  ;;  %v761_v59 = vpop.permute.xlu1 %760 }
 0x139   : > { %vm569_vm11 = vcmp.gt.f32.partialorder %v547_v0, 0.0  ;;  %v581_v5 = vmul.f32 0.01, %v547_v0  ;;  %v2301_v6 = vpack.c.bf16 %v591_v2, %v590_v4 }
 0x13a   : > { %vm568_vm12 = vcmp.gt.f32.partialorder %v542_v3, 0.0  ;;  %v580_v8 = vmul.f32 0.01, %v542_v3  ;;  %v2108_v9 = vpop.f32.mrb[10].mxu0 }
 0x13b   : > { %v557_v11 = vadd.f32 %v2108_v9, %v348_v7  ;;  %v551_v12 = vpop.f32.mrb[11].mxu0  ;;  %2302 = vmatprep.subr.bf16.mxu1 %v2301_v6  ;;  %v593_v13 = vsel %vm569_vm11, %v547_v0, %v581_v5  ;;  %v756_v62 = vpop.permute.xlu0 %755 }
 0x13c   : > { %v552_v14 = vadd.f32 %v551_v12, %v343_v10  ;;  %2304 = vmatpush3.bf16.msra.mxu1 %v2301_v6  ;;  %v592_v15 = vsel %vm568_vm12, %v542_v3, %v580_v8  ;;  %v1886_v10 = vld [vmem:[%s2870_s4 + $0x28] sm:$0xff]  ;;  %v1888_v12 = vld [vmem:[%s2870_s4 + $0x38] sm:$0xff] }
 0x13d   : > { %vm571_vm13 = vcmp.gt.f32.partialorder %v557_v11, 0.0  ;;  %v583_v16 = vmul.f32 0.01, %v557_v11  ;;  %v2305_v17 = vpack.c.bf16 %v593_v13, %v592_v15  ;;  %v1897_v13 = vld [vmem:[%s2870_s4 + $0x40] sm:$0xff] }
 0x13e   : > { %vm570_vm14 = vcmp.gt.f32.partialorder %v552_v14, 0.0  ;;  %v582_v18 = vmul.f32 0.01, %v552_v14 }
 0x13f   : > { %2306 = vmatprep.subr.bf16.mxu1 %v2305_v17  ;;  %v595_v19 = vsel %vm571_vm13, %v557_v11, %v583_v16  ;;  %v1887_v11 = vld [vmem:[%s2870_s4 + $0x30] sm:$0xff]  ;;  %v886_v15 = vpop.permute.xlu0 %885 }
 0x140   : > { %2308 = vmatpush3.bf16.msra.mxu1 %v2305_v17  ;;  %v594_v20 = vsel %vm570_vm14, %v552_v14, %v582_v18  ;;  %v891_v14 = vpop.permute.xlu1 %890 }
 0x141   : > { %v2309_v21 = vpack.c.bf16 %v595_v19, %v594_v20 }
 0x143   : > { %2310 = vmatprep.subr.bf16.mxu1 %v2309_v21 }
 0x144   : > { %2312 = vmatpush3.bf16.msra.mxu1 %v2309_v21  ;;  %v901_v21 = vpop.permute.xlu1 %900 }
 0x147   : > { %2134 = vmatmul.mubr.msk.f32.vlgmr.msra.gmra.mrb[0].mxu1 %vm624_vm2, %v597_v22 }
 0x148   : > { %2136 = vmatprep.mubr.msk.f32.mxu1 %vm624_vm2, %v598_v23 }
 0x14b   : > { %2137 = vmatmul.mubr.msk.f32.gmra.mrb[2].mxu1 %vm624_vm2, %v599_v24  ;;  %v896_v24 = vpop.permute.xlu0 %895 }
 0x14c   : > { %2147 = vmatprep.mubr.msk.f32.mxu1 %vm763_vm15, %v734_v25 }
 0x21a   : > { %v2135_v28 = vpop.f32.mrb[0].mxu1 }
 0x21b   : > { %v709_v29 = vadd.f32 %v2135_v28, %v612_v26  ;;  %v703_v30 = vpop.f32.mrb[1].mxu1 }
 0x21c   : > { %v704_v31 = vadd.f32 %v703_v30, %v607_v27 }
 0x21d   : > { %vm723_vm1 = vcmp.gt.f32.partialorder %v709_v29, 0.0  ;;  %v727_v32 = vmul.f32 0.01, %v709_v29 }
 0x21e   : > { %vm722_vm3 = vcmp.gt.f32.partialorder %v704_v31, 0.0  ;;  %v726_v34 = vmul.f32 0.01, %v704_v31  ;;  %v2138_v35 = vpop.f32.mrb[2].mxu1 }
 0x21f   : > { %v719_v37 = vadd.f32 %v2138_v35, %v622_v33  ;;  %v713_v38 = vpop.f32.mrb[3].mxu1  ;;  %v2706_v39 = vsel %vm723_vm1, %v709_v29, %v727_v32 }
 0x220   : > { %v714_v40 = vadd.f32 %v713_v38, %v617_v36  ;;  %v2708_v41 = vsel %vm722_vm3, %v704_v31, %v726_v34 }
 0x221   : > { %vm725_vm2 = vcmp.gt.f32.partialorder %v719_v37, 0.0  ;;  %v729_v42 = vmul.f32 0.01, %v719_v37  ;;  %v2313_v43 = vpack.c.bf16 %v2706_v39, %v2708_v41 }
 0x222   : > { %vm724_vm4 = vcmp.gt.f32.partialorder %v714_v40, 0.0  ;;  %v728_v44 = vmul.f32 0.01, %v714_v40 }
 0x223   : > { %2314 = vmatprep.subr.bf16.mxu1 %v2313_v43  ;;  %v2712_v45 = vsel %vm725_vm2, %v719_v37, %v729_v42  ;;  %v1900_v42 = vld [vmem:[%s2870_s4 + $0x58] sm:$0xff] }
 0x224   : > { %2316 = vmatpush3.bf16.msra.mxu1 %v2313_v43  ;;  %v2714_v46 = vsel %vm724_vm4, %v714_v40, %v728_v44  ;;  %v1898_v40 = vld [vmem:[%s2870_s4 + $0x48] sm:$0xff]  ;;  %v1909_v43 = vld [vmem:[%s2870_s4 + $0x60] sm:$0xff]  ;;  %v1034_v44 = vpop.permute.xlu1 %1033 }
 0x225   : > { %v2317_v47 = vpack.c.bf16 %v2712_v45, %v2714_v46 }
 0x227   : > { %2318 = vmatprep.subr.bf16.mxu1 %v2317_v47 }
 0x228   : > { %2320 = vmatpush3.bf16.msra.mxu1 %v2317_v47 }
 0x22b   : > { %2148 = vmatmul.mubr.msk.f32.vlgmr.msra.gmra.mrb[4].mxu1 %vm763_vm15, %v735_v48 }
 0x22c   : > { %2150 = vmatprep.mubr.msk.f32.mxu1 %vm763_vm15, %v736_v49 }
 0x22f   : > { %2151 = vmatmul.mubr.msk.f32.gmra.mrb[6].mxu1 %vm763_vm15, %v737_v50 }
 0x230   : > { %2161 = vmatprep.mubr.msk.f32.mxu1 %vm763_vm15, %v1885_v51  ;;  %v1044_v51 = vpop.permute.xlu1 %1043 }
 0x2fe   : > { %v2149_v54 = vpop.f32.mrb[4].mxu1 }
 0x2ff   : > { %v848_v55 = vadd.f32 %v2149_v54, %v751_v52  ;;  %v842_v56 = vpop.f32.mrb[5].mxu1 }
 0x300   : > { %v843_v57 = vadd.f32 %v842_v56, %v746_v53 }
 0x301   : > { %vm862_vm5 = vcmp.gt.f32.partialorder %v848_v55, 0.0  ;;  %v866_v58 = vmul.f32 0.01, %v848_v55 }
 0x302   : > { %vm861_vm6 = vcmp.gt.f32.partialorder %v843_v57, 0.0  ;;  %v865_v60 = vmul.f32 0.01, %v843_v57  ;;  %v2152_v61 = vpop.f32.mrb[6].mxu1 }
 0x303   : > { %v858_v63 = vadd.f32 %v2152_v61, %v761_v59  ;;  %v852_v0 = vpop.f32.mrb[7].mxu1  ;;  %v870_v1 = vsel %vm862_vm5, %v848_v55, %v866_v58 }
 0x304   : > { %v853_v2 = vadd.f32 %v852_v0, %v756_v62  ;;  %v869_v3 = vsel %vm861_vm6, %v843_v57, %v865_v60 }
 0x305   : > { %vm864_vm7 = vcmp.gt.f32.partialorder %v858_v63, 0.0  ;;  %v868_v4 = vmul.f32 0.01, %v858_v63  ;;  %v2321_v5 = vpack.c.bf16 %v870_v1, %v869_v3  ;;  %v1911_v3 = vld [vmem:[%s2870_s4 + $0x70] sm:$0xff] }
 0x306   : > { %vm863_vm8 = vcmp.gt.f32.partialorder %v853_v2, 0.0  ;;  %v867_v6 = vmul.f32 0.01, %v853_v2 }
 0x307   : > { %2322 = vmatprep.subr.bf16.mxu1 %v2321_v5  ;;  %v872_v7 = vsel %vm864_vm7, %v858_v63, %v868_v4  ;;  %v1912_v4 = vld [vmem:[%s2870_s4 + $0x78] sm:$0xff] }
 0x308   : > { %2324 = vmatpush3.bf16.msra.mxu1 %v2321_v5  ;;  %v871_v8 = vsel %vm863_vm8, %v853_v2, %v867_v6  ;;  %v1910_v2 = vld [vmem:[%s2870_s4 + $0x68] sm:$0xff]  ;;  %v1921_v5 = vld [vmem:[%s2870_s4 + $0x80] sm:$0xff]  ;;  %v1173_v6 = vpop.permute.xlu1 %1172 }
 0x309   : > { %v2325_v9 = vpack.c.bf16 %v872_v7, %v871_v8 }
 0x30b   : > { %2326 = vmatprep.subr.bf16.mxu1 %v2325_v9 }
 0x30c   : > { %2328 = vmatpush3.bf16.msra.mxu1 %v2325_v9 }
 0x30f   : > { %2162 = vmatmul.mubr.msk.f32.vlgmr.msra.gmra.mrb[8].mxu1 %vm763_vm15, %v1886_v10 }
 0x310   : > { %2164 = vmatprep.mubr.msk.f32.mxu1 %vm763_vm15, %v1887_v11 }
 0x313   : > { %2165 = vmatmul.mubr.msk.f32.gmra.mrb[10].mxu1 %vm763_vm15, %v1888_v12 }
 0x314   : > { %2175 = vmatprep.mubr.msk.f32.mxu1 %vm763_vm15, %v1897_v13  ;;  %v1183_v13 = vpop.permute.xlu1 %1182 }
 0x3e2   : > { %v2163_v16 = vpop.f32.mrb[8].mxu1 }
 0x3e3   : > { %v987_v17 = vadd.f32 %v2163_v16, %v891_v14  ;;  %v981_v18 = vpop.f32.mrb[9].mxu1 }
 0x3e4   : > { %v982_v19 = vadd.f32 %v981_v18, %v886_v15 }
 0x3e5   : > { %v1001_v20 = vadd.f32 %v987_v17, %v2706_v39 }
 0x3e6   : > { %v1000_v22 = vadd.f32 %v982_v19, %v2708_v41  ;;  %v2166_v23 = vpop.f32.mrb[10].mxu1  ;;  %v1899_v41 = vld [vmem:[%s2870_s4 + $0x50] sm:$0xff] }
 0x3e7   : > { %vm1005_vm9 = vcmp.gt.f32.partialorder %v1001_v20, 0.0  ;;  %v1009_v25 = vmul.f32 0.01, %v1001_v20  ;;  %v997_v26 = vadd.f32 %v2166_v23, %v901_v21  ;;  %v991_v27 = vpop.f32.mrb[11].mxu1 }
 0x3e8   : > { %vm1004_vm10 = vcmp.gt.f32.partialorder %v1000_v22, 0.0  ;;  %v1008_v28 = vmul.f32 0.01, %v1000_v22  ;;  %v992_v29 = vadd.f32 %v991_v27, %v896_v24 }
 0x3e9   : > { %v1003_v30 = vadd.f32 %v997_v26, %v2712_v45  ;;  %v2753_v31 = vsel %vm1005_vm9, %v1001_v20, %v1009_v25  ;;  %v1029_v45 = vpop.permute.xlu0 %1028 }
 0x3ea   : > { %v1002_v32 = vadd.f32 %v992_v29, %v2714_v46  ;;  %v2756_v33 = vsel %vm1004_vm10, %v1000_v22, %v1008_v28 }
 0x3eb   : > { %vm1007_vm11 = vcmp.gt.f32.partialorder %v1003_v30, 0.0  ;;  %v1011_v34 = vmul.f32 0.01, %v1003_v30  ;;  %v2329_v35 = vpack.c.bf16 %v2753_v31, %v2756_v33 }
 0x3ec   : > { %vm1006_vm12 = vcmp.gt.f32.partialorder %v1002_v32, 0.0  ;;  %v1010_v36 = vmul.f32 0.01, %v1002_v32 }
 0x3ed   : > { %2330 = vmatprep.subr.bf16.mxu1 %v2329_v35  ;;  %v2760_v37 = vsel %vm1007_vm11, %v1003_v30, %v1011_v34  ;;  %v1039_v54 = vpop.permute.xlu0 %1038  ;;  %v1924_v34 = vld [vmem:[%s2870_s4 + $0x98] sm:$0xff] }
 0x3ee   : > { %2332 = vmatpush3.bf16.msra.mxu1 %v2329_v35  ;;  %v2762_v38 = vsel %vm1006_vm12, %v1002_v32, %v1010_v36  ;;  %v1922_v32 = vld [vmem:[%s2870_s4 + $0x88] sm:$0xff]  ;;  %v1933_v35 = vld [vmem:[%s2870_s4 + $0xa0] sm:$0xff]  ;;  %v1316_v36 = vpop.permute.xlu1 %1315 }
 0x3ef   : > { %v2333_v39 = vpack.c.bf16 %v2760_v37, %v2762_v38 }
 0x3f1   : > { %2334 = vmatprep.subr.bf16.mxu1 %v2333_v39  ;;  %v1168_v7 = vpop.permute.xlu0 %1167 }
 0x3f2   : > { %2336 = vmatpush3.bf16.msra.mxu1 %v2333_v39 }
 0x3f5   : > { %2176 = vmatmul.mubr.msk.f32.vlgmr.msra.gmra.mrb[12].mxu1 %vm763_vm15, %v1898_v40  ;;  %v1178_v16 = vpop.permute.xlu0 %1177 }
 0x3f6   : > { %2178 = vmatprep.mubr.msk.f32.mxu1 %vm763_vm15, %v1899_v41 }
 0x3f9   : > { %2179 = vmatmul.mubr.msk.f32.gmra.mrb[14].mxu1 %vm763_vm15, %v1900_v42 }
 0x3fa   : > { %2189 = vmatprep.mubr.msk.f32.mxu1 %vm763_vm15, %v1909_v43  ;;  %v1326_v43 = vpop.permute.xlu1 %1325 }
 0x4c8   : > { %v2177_v46 = vpop.f32.mrb[12].mxu1 }
 0x4c9   : > { %v1130_v47 = vadd.f32 %v2177_v46, %v1034_v44  ;;  %v1124_v48 = vpop.f32.mrb[13].mxu1 }
 0x4ca   : > { %v1125_v49 = vadd.f32 %v1124_v48, %v1029_v45 }
 0x4cb   : > { %vm1144_vm13 = vcmp.gt.f32.partialorder %v1130_v47, 0.0  ;;  %v1148_v50 = vmul.f32 0.01, %v1130_v47 }
 0x4cc   : > { %vm1143_vm14 = vcmp.gt.f32.partialorder %v1125_v49, 0.0  ;;  %v1147_v52 = vmul.f32 0.01, %v1125_v49  ;;  %v2180_v53 = vpop.f32.mrb[14].mxu1 }
 0x4cd   : > { %v1140_v55 = vadd.f32 %v2180_v53, %v1044_v51  ;;  %v1134_v56 = vpop.f32.mrb[15].mxu1  ;;  %v1152_v57 = vsel %vm1144_vm13, %v1130_v47, %v1148_v50 }
 0x4ce   : > { %v1135_v58 = vadd.f32 %v1134_v56, %v1039_v54  ;;  %v1151_v59 = vsel %vm1143_vm14, %v1125_v49, %v1147_v52 }
 0x4cf   : > { %vm1146_vm1 = vcmp.gt.f32.partialorder %v1140_v55, 0.0  ;;  %v1150_v60 = vmul.f32 0.01, %v1140_v55  ;;  %v2337_v61 = vpack.c.bf16 %v1152_v57, %v1151_v59  ;;  %v1935_v59 = vld [vmem:[%s2870_s4 + $0xb0] sm:$0xff] }
 0x4d0   : > { %vm1145_vm3 = vcmp.gt.f32.partialorder %v1135_v58, 0.0  ;;  %v1149_v62 = vmul.f32 0.01, %v1135_v58 }
 0x4d1   : > { %2338 = vmatprep.subr.bf16.mxu1 %v2337_v61  ;;  %v1154_v63 = vsel %vm1146_vm1, %v1140_v55, %v1150_v60  ;;  %v1936_v60 = vld [vmem:[%s2870_s4 + $0xb8] sm:$0xff]  ;;  %vm2396_vm1 = vmmov 0  }
 0x4d2   : > { %2340 = vmatpush3.bf16.msra.mxu1 %v2337_v61  ;;  %v1153_v0 = vsel %vm1145_vm3, %v1135_v58, %v1149_v62  ;;  %v1934_v58 = vld [vmem:[%s2870_s4 + $0xa8] sm:$0xff]  ;;  %v1945_v61 = vld [vmem:[%s2870_s4 + $0xc0] sm:$0xff]  ;;  %v1455_v62 = vpop.permute.xlu1 %1454 }
 0x4d3   : > { %v2341_v1 = vpack.c.bf16 %v1154_v63, %v1153_v0 }
 0x4d5   : > { %2342 = vmatprep.subr.bf16.mxu1 %v2341_v1 }
 0x4d6   : > { %2344 = vmatpush3.bf16.msra.mxu1 %v2341_v1 }
 0x4d9   : > { %2190 = vmatmul.mubr.msk.f32.vlgmr.msra.gmra.mrb[16].mxu1 %vm763_vm15, %v1910_v2 }
 0x4da   : > { %2192 = vmatprep.mubr.msk.f32.mxu1 %vm763_vm15, %v1911_v3 }
 0x4dd   : > { %2193 = vmatmul.mubr.msk.f32.gmra.mrb[18].mxu1 %vm763_vm15, %v1912_v4 }
 0x4de   : > { %2203 = vmatprep.mubr.msk.f32.mxu1 %vm763_vm15, %v1921_v5  ;;  %v1465_v5 = vpop.permute.xlu1 %1464 }
 0x5ac   : > { %v2191_v8 = vpop.f32.mrb[16].mxu1 }
 0x5ad   : > { %v1269_v9 = vadd.f32 %v2191_v8, %v1173_v6  ;;  %v1263_v10 = vpop.f32.mrb[17].mxu1 }
 0x5ae   : > { %v1264_v11 = vadd.f32 %v1263_v10, %v1168_v7 }
 0x5af   : > { %v1283_v12 = vadd.f32 %v1269_v9, %v2753_v31 }
 0x5b0   : > { %v1282_v14 = vadd.f32 %v1264_v11, %v2756_v33  ;;  %v2194_v15 = vpop.f32.mrb[18].mxu1  ;;  %v1923_v33 = vld [vmem:[%s2870_s4 + $0x90] sm:$0xff] }
 0x5b1   : > { %vm1287_vm2 = vcmp.gt.f32.partialorder %v1283_v12, 0.0  ;;  %v1291_v17 = vmul.f32 0.01, %v1283_v12  ;;  %v1279_v18 = vadd.f32 %v2194_v15, %v1183_v13  ;;  %v1273_v19 = vpop.f32.mrb[19].mxu1 }
 0x5b2   : > { %vm1286_vm4 = vcmp.gt.f32.partialorder %v1282_v14, 0.0  ;;  %v1290_v20 = vmul.f32 0.01, %v1282_v14  ;;  %v1274_v21 = vadd.f32 %v1273_v19, %v1178_v16 }
 0x5b3   : > { %v1285_v22 = vadd.f32 %v1279_v18, %v2760_v37  ;;  %v2801_v23 = vsel %vm1287_vm2, %v1283_v12, %v1291_v17  ;;  %v1311_v37 = vpop.permute.xlu0 %1310 }
 0x5b4   : > { %v1284_v24 = vadd.f32 %v1274_v21, %v2762_v38  ;;  %v2804_v25 = vsel %vm1286_vm4, %v1282_v14, %v1290_v20 }
 0x5b5   : > { %vm1289_vm5 = vcmp.gt.f32.partialorder %v1285_v22, 0.0  ;;  %v1293_v26 = vmul.f32 0.01, %v1285_v22  ;;  %v2345_v27 = vpack.c.bf16 %v2801_v23, %v2804_v25 }
 0x5b6   : > { %vm1288_vm6 = vcmp.gt.f32.partialorder %v1284_v24, 0.0  ;;  %v1292_v28 = vmul.f32 0.01, %v1284_v24 }
 0x5b7   : > { %2346 = vmatprep.subr.bf16.mxu1 %v2345_v27  ;;  %v2808_v29 = vsel %vm1289_vm5, %v1285_v22, %v1293_v26  ;;  %v1321_v46 = vpop.permute.xlu0 %1320  ;;  %v2397_v26 = vmov 0.0  }
 0x5b8   : > { %2348 = vmatpush3.bf16.msra.mxu1 %v2345_v27  ;;  %v2810_v30 = vsel %vm1288_vm6, %v1284_v24, %v1292_v28  ;;  %v1946_v24 = vld [vmem:[%s2870_s4 + $0xc8] sm:$0xff]  ;;  %v1594_v27 = vpop.permute.xlu1 %1593 }
 0x5b9   : > { %v2349_v31 = vpack.c.bf16 %v2808_v29, %v2810_v30 }
 0x5bb   : > { %2350 = vmatprep.subr.bf16.mxu1 %v2349_v31  ;;  %v1450_v63 = vpop.permute.xlu0 %1449 }
 0x5bc   : > { %2352 = vmatpush3.bf16.msra.mxu1 %v2349_v31 }
 0x5bf   : > { %2204 = vmatmul.mubr.msk.f32.vlgmr.msra.gmra.mrb[20].mxu1 %vm763_vm15, %v1922_v32  ;;  %v1460_v8 = vpop.permute.xlu0 %1459 }
 0x5c0   : > { %2206 = vmatprep.mubr.msk.f32.mxu1 %vm763_vm15, %v1923_v33 }
 0x5c3   : > { %2207 = vmatmul.mubr.msk.f32.gmra.mrb[22].mxu1 %vm763_vm15, %v1924_v34 }
 0x5c4   : > { %2217 = vmatprep.mubr.msk.f32.mxu1 %vm763_vm15, %v1933_v35 }
 0x692   : > { %v2205_v38 = vpop.f32.mrb[20].mxu1 }
 0x693   : > { %v1412_v39 = vadd.f32 %v2205_v38, %v1316_v36  ;;  %v1406_v40 = vpop.f32.mrb[21].mxu1  ;;  %v1951_v38 = vld [vmem:[%s2870_s4 + $0xe0] sm:$0xff] }
 0x694   : > { %v1407_v41 = vadd.f32 %v1406_v40, %v1311_v37 }
 0x695   : > { %vm1426_vm7 = vcmp.gt.f32.partialorder %v1412_v39, 0.0  ;;  %v1430_v42 = vmul.f32 0.01, %v1412_v39 }
 0x696   : > { %vm1425_vm8 = vcmp.gt.f32.partialorder %v1407_v41, 0.0  ;;  %v1429_v44 = vmul.f32 0.01, %v1407_v41  ;;  %v2208_v45 = vpop.f32.mrb[22].mxu1 }
 0x697   : > { %v1422_v47 = vadd.f32 %v2208_v45, %v1326_v43  ;;  %v1416_v48 = vpop.f32.mrb[23].mxu1  ;;  %v1434_v49 = vsel %vm1426_vm7, %v1412_v39, %v1430_v42 }
 0x698   : > { %v1417_v50 = vadd.f32 %v1416_v48, %v1321_v46  ;;  %v1433_v51 = vsel %vm1425_vm8, %v1407_v41, %v1429_v44  ;;  %v1773_v44 = vpop.permute.xlu1 %1772 }
 0x699   : > { %vm1428_vm9 = vcmp.gt.f32.partialorder %v1422_v47, 0.0  ;;  %v1432_v52 = vmul.f32 0.01, %v1422_v47  ;;  %v2353_v53 = vpack.c.bf16 %v1434_v49, %v1433_v51 }
 0x69a   : > { %vm1427_vm10 = vcmp.gt.f32.partialorder %v1417_v50, 0.0  ;;  %v1431_v54 = vmul.f32 0.01, %v1417_v50 }
 0x69b   : > { %2354 = vmatprep.subr.bf16.mxu1 %v2353_v53  ;;  %v1436_v55 = vsel %vm1428_vm9, %v1422_v47, %v1432_v52 }
 0x69c   : > { %2356 = vmatpush3.bf16.msra.mxu1 %v2353_v53  ;;  %v1435_v56 = vsel %vm1427_vm10, %v1417_v50, %v1431_v54 }
 0x69d   : > { %v2357_v57 = vpack.c.bf16 %v1436_v55, %v1435_v56 }
 0x69f   : > { %2358 = vmatprep.subr.bf16.mxu1 %v2357_v57 }
 0x6a0   : > { %2360 = vmatpush3.bf16.msra.mxu1 %v2357_v57 }
 0x6a3   : > { %2218 = vmatmul.mubr.msk.f32.vlgmr.msra.gmra.mrb[24].mxu1 %vm763_vm15, %v1934_v58 }
 0x6a4   : > { %2220 = vmatprep.mubr.msk.f32.mxu1 %vm763_vm15, %v1935_v59 }
 0x6a7   : > { %2221 = vmatmul.mubr.msk.f32.gmra.mrb[26].mxu1 %vm763_vm15, %v1936_v60 }
 0x6a8   : > { %2231 = vmatprep.mubr.msk.f32.mxu1 %vm763_vm15, %v1945_v61 }
 0x776   : > { %v2219_v0 = vpop.f32.mrb[24].mxu1 }
 0x777   : > { %v1551_v1 = vadd.f32 %v2219_v0, %v1455_v62  ;;  %v1545_v2 = vpop.f32.mrb[25].mxu1 }
 0x778   : > { %v1546_v3 = vadd.f32 %v1545_v2, %v1450_v63 }
 0x779   : > { %v1565_v4 = vadd.f32 %v1551_v1, %v2801_v23 }
 0x77a   : > { %v1564_v6 = vadd.f32 %v1546_v3, %v2804_v25  ;;  %v2222_v7 = vpop.f32.mrb[26].mxu1  ;;  %v2395_v25 = vmov 0.0|0.0  }
 0x77b   : > { %vm1569_vm11 = vcmp.gt.f32.partialorder %v1565_v4, 0.0  ;;  %v1573_v9 = vmul.f32 0.01, %v1565_v4  ;;  %v1561_v10 = vadd.f32 %v2222_v7, %v1465_v5  ;;  %v1555_v11 = vpop.f32.mrb[27].mxu1 }
 0x77c   : > { %vm1568_vm12 = vcmp.gt.f32.partialorder %v1564_v6, 0.0  ;;  %v1572_v12 = vmul.f32 0.01, %v1564_v6  ;;  %v1556_v13 = vadd.f32 %v1555_v11, %v1460_v8 }
 0x77d   : > { %v1567_v14 = vadd.f32 %v1561_v10, %v2808_v29  ;;  %v1577_v15 = vsel %vm1569_vm11, %v1565_v4, %v1573_v9  ;;  %v1589_v29 = vpop.permute.xlu0 %1588 }
 0x77e   : > { %v1566_v16 = vadd.f32 %v1556_v13, %v2810_v30  ;;  %v1576_v17 = vsel %vm1568_vm12, %v1564_v6, %v1572_v12 }
 0x77f   : > { %vm1571_vm13 = vcmp.gt.f32.partialorder %v1567_v14, 0.0  ;;  %v1575_v18 = vmul.f32 0.01, %v1567_v14  ;;  %v2361_v19 = vpack.c.bf16 %v1577_v15, %v1576_v17 }
 0x780   : > { %vm1570_vm14 = vcmp.gt.f32.partialorder %v1566_v16, 0.0  ;;  %v1574_v20 = vmul.f32 0.01, %v1566_v16 }
 0x781   : > { %2362 = vmatprep.subr.bf16.mxu1 %v2361_v19  ;;  %v1579_v21 = vsel %vm1571_vm13, %v1567_v14, %v1575_v18  ;;  %v1690_v39 = vpop.permute.xlu0 %1689 }
 0x782   : > { %2364 = vmatpush3.bf16.msra.mxu1 %v2361_v19  ;;  %v1578_v22 = vsel %vm1570_vm14, %v1566_v16, %v1574_v20 }
 0x783   : > { %v2365_v23 = vpack.c.bf16 %v1579_v21, %v1578_v22 }
 0x785   : > { %2366 = vmatprep.subr.bf16.mxu1 %v2365_v23  ;;  %v1787_v53 = vpop.permute.xlu0 %1786 }
 0x786   : > { %2368 = vmatpush3.bf16.msra.mxu1 %v2365_v23 }
 0x787   : > { %2369 = vmatprep.subr.bf16.mxu1 %v2395_v25 }
 0x789   : > { %2232 = vmatmul.mubr.msk.f32.vlgmr.msra.gmra.mrb[28].mxu1 %vm763_vm15, %v1946_v24 }
 0x78a   : > { %2238 = vmatprep.mubr.msk.f32.mxu1 %vm2396_vm1, %v2397_v26 }
 0x85c   : > { %v2233_v28 = vpop.f32.mrb[28].mxu1 }
 0x85d   : > { %v1674_v30 = vadd.f32 %v2233_v28, %v1594_v27  ;;  %v1668_v31 = vpop.f32.mrb[29].mxu1 }
 0x85e   : > { %v1669_v32 = vadd.f32 %v1668_v31, %v1589_v29 }
 0x85f   : > { %vm1678_vm3 = vcmp.gt.f32.partialorder %v1674_v30, 0.0  ;;  %v1680_v33 = vmul.f32 0.01, %v1674_v30 }
 0x860   : > { %vm1677_vm2 = vcmp.gt.f32.partialorder %v1669_v32, 0.0  ;;  %v1679_v34 = vmul.f32 0.01, %v1669_v32 }
 0x861   : > { %v1682_v35 = vsel %vm1678_vm3, %v1674_v30, %v1680_v33 }
 0x862   : > { %v1681_v36 = vsel %vm1677_vm2, %v1669_v32, %v1679_v34 }
 0x863   : > { %v2370_v37 = vpack.c.bf16 %v1682_v35, %v1681_v36 }
 0x865   : > { %2371 = vmatpush3.bf16.msra.mxu1 %v2370_v37 }
 0x868   : > { %2239 = vmatmul.mubr.msk.f32.vlgmr.msra.gmra.mrb[30].mxu1 %vm350_vm0, %v1951_v38 }
 0x93b   : > { %v1761_v40 = vpop.f32.mrb[30].mxu1 }
 0x93c   : > { %v1762_v41 = vadd.f32 %v1761_v40, %v1690_v39  ;;  %v2240_v42 = vpop.f32.mrb[31].mxu1 }
 0x93e   : > { %vm1765_vm15 = vcmp.gt.f32.partialorder %v1762_v41, 0.0  ;;  %v1766_v43 = vmul.f32 0.01, %v1762_v41 }
 0x940   : > { %v1767_v45 = vsel %vm1765_vm15, %v1762_v41, %v1766_v43 }
 0x941   : > { %v1775_v46 = vmul.f32 %v1773_v44, %v1767_v45 }
 0x943   : > { %v1776_v47 = vrot.slane %v1775_v46, 4 }
 0x945   : > { %v1777_v48 = vadd.f32 %v1776_v47, %v1775_v46 }
 0x947   : > { %v1778_v49 = vrot.slane %v1777_v48, 2 }
 0x949   : > { %v1779_v50 = vadd.f32 %v1778_v49, %v1777_v48 }
 0x94b   : > { %v1780_v51 = vrot.slane %v1779_v50, 1 }
 0x94d   : > { %v1781_v52 = vadd.f32 %v1780_v51, %v1779_v50 }
 0x94f   : > { %v1789_v54 = vadd.f32 %v1787_v53, %v1781_v52 }
 0x951   : > { %1790 = vst [vmem:[%s249_s7] sm:$0x1] %v1789_v54 }
 0x952 PF: > { %s16_s21 = sadd.s32 1, %s2392_s21  }
 0x953   : > { %p13_p5 = scmp.ge.s32.totalorder %s16_s21, 4  }
 0x955   :  { %15 = sbr.rel (!%p13_p5) target bundleno = 1 (0x1), region = 91 }

</bundles_post_ra>
